<compile_context>
chip_gen: v7x
topology: tpu7x:2x2x1
jax: 0.10.0
libtpu: 0.0.40
codegen_flags: <defaults>
</compile_context>

<pallas_src>
import jax
import jax.numpy as jnp
from jax.experimental import pallas as pl
from jax.experimental.pallas import tpu as pltpu

_LANES = 128
_ROW_ALIGN = 32            # multiple of the sublane tiling for f32/bf16/int8
_TARGET_BLOCK_ROWS = 4096  # 2 MiB per f32 input block; 8 MiB double-buffered


def _psnr_partial_kernel(a_ref, b_ref, o_ref):
    # o_ref is the (1, 8, 128) per-part partial-sum block, resident in VMEM
    # across the reduction axis (same block index for every i).
    @pl.when(pl.program_id(1) == 0)
    def _():
        o_ref[...] = jnp.zeros_like(o_ref)

    # Stream native dtype, upcast in-kernel (cheap VPU cast, hidden under DMA).
    a = a_ref[...].astype(jnp.float32)
    b = b_ref[...].astype(jnp.float32)
    # Fused affine transform: the 127.5^2 scale is applied once in the wrapper.
    d = a - b
    sq = d * d
    blk_rows = sq.shape[0]
    # Fold the block into an (8, 128) vreg shape: pure vreg-vs-vreg adds (VPU),
    # no cross-lane/XLU work in the hot loop.
    o_ref[...] += jnp.sum(sq.reshape(blk_rows // 8, 8, _LANES), axis=0,
                          keepdims=True)


def psnr_pallas(img1: jax.Array, img2: jax.Array) -> jax.Array:
    """PSNR of two images in range [-1, 1] (matches the PyTorch PSNR module).

    Accepts any shape (e.g. NCHW); both inputs must have the same shape.
    """
    assert img1.shape == img2.shape, "img1/img2 must have the same shape"
    total = 1
    for s in img1.shape:
        total *= s

    # --- tiling choices (Python ints, resolved at trace time) ---
    rows0 = -(-total // _LANES)                      # ceil(total / 128)
    num_parts = 2 if rows0 >= 256 else 1             # dual-TC split on v7x
    block_rows = min(_TARGET_BLOCK_ROWS, -(-rows0 // num_parts))
    block_rows = ((block_rows + _ROW_ALIGN - 1) // _ROW_ALIGN) * _ROW_ALIGN
    steps = -(-rows0 // (num_parts * block_rows))    # reduction steps per part
    padded_rows = num_parts * block_rows * steps
    padded_total = padded_rows * _LANES

    def to_slab(x):
        flat = x.reshape(-1)
        if padded_total != total:
            # zero padding: (0 - 0)^2 contributes nothing to the sum
            flat = jnp.pad(flat, (0, padded_total - total))
        return flat.reshape(padded_rows, _LANES)

    a2d = to_slab(img1)
    b2d = to_slab(img2)

    in_spec = pl.BlockSpec((block_rows, _LANES),
                           lambda p, i: (p * steps + i, 0))

    partials = pl.pallas_call(
        _psnr_partial_kernel,
        out_shape=jax.ShapeDtypeStruct((num_parts, 8, _LANES), jnp.float32),
        grid_spec=pltpu.PrefetchScalarGridSpec(
            num_scalar_prefetch=0,
            grid=(num_parts, steps),
            in_specs=[in_spec, in_spec],
            out_specs=pl.BlockSpec((1, 8, _LANES), lambda p, i: (p, 0, 0)),
        ),
        compiler_params=pltpu.CompilerParams(
            dimension_semantics=("parallel", "arbitrary"),
            vmem_limit_bytes=32 << 20,
        ),
    )(a2d, b2d)

    # Final tiny reduction + scalar math in the wrapper (negligible work).
    sum_sq = jnp.sum(partials) * jnp.float32(127.5 * 127.5)
    mse = sum_sq / jnp.float32(total)
    return 20.0 * jnp.log10(255.0 / jnp.sqrt(mse))


def psnr_reference(img1, img2):
    """Pure-JAX reference matching the PyTorch module."""
    a = (img1.astype(jnp.float32) / 2.0 + 0.5) * 255.0
    b = (img2.astype(jnp.float32) / 2.0 + 0.5) * 255.0
    mse = jnp.mean((a - b) ** 2)
    return 20.0 * jnp.log10(255.0 / jnp.sqrt(mse))


if __name__ == "__main__":
    key = jax.random.PRNGKey(0)
    k1, k2 = jax.random.split(key)
    # NCHW inputs in [-1, 1]
    shape = (2, 4, 16, 16)
    img1 = jax.random.uniform(k1, shape, jnp.float32, minval=-1.0, maxval=1.0)
    img2 = jax.random.uniform(k2, shape, jnp.float32, minval=-1.0, maxval=1.0)

    out = jax.block_until_ready(psnr_pallas(img1, img2))
    ref = jax.block_until_ready(psnr_reference(img1, img2))

    assert jnp.allclose(out, ref, rtol=1e-4, atol=1e-4), (out, ref)
    print("KERNEL_OK")
</pallas_src>

<mosaic_0001>
module attributes {stable_mosaic.version = 11 : i64} {
  func.func @_psnr_partial_kernel(%arg0: i32, %arg1: i32, %arg2: memref<32x128xf32, #tpu.memory_space<vmem>>, %arg3: memref<32x128xf32, #tpu.memory_space<vmem>>, %arg4: memref<1x8x128xf32, #tpu.memory_space<vmem>>) attributes {dimension_semantics = [#tpu.dimension_semantics<parallel>, #tpu.dimension_semantics<arbitrary>], iteration_bounds = array<i64: 1, 1>, scalar_prefetch = 0 : i64, scratch_operands = 0 : i64, tpu.core_type = #tpu.core_type<tc>, window_params = [{transform_indices = @transform_0, window_bounds = array<i64: 32, 128>}, {transform_indices = @transform_1, window_bounds = array<i64: 32, 128>}, {transform_indices = @transform_2, window_bounds = array<i64: 1, 8, 128>}]} {
    %c0_i32 = arith.constant 0 : i32
    %0 = arith.cmpi eq, %arg1, %c0_i32 : i32
    %1 = arith.extui %0 : i1 to i32
    %c0_i32_0 = arith.constant 0 : i32
    %2 = arith.cmpi ne, %1, %c0_i32_0 : i32
    scf.if %2 {
      %cst_10 = arith.constant 0.000000e+00 : f32
      %13 = vector.broadcast %cst_10 : f32 to vector<1x8x128xf32>
      %c0_11 = arith.constant 0 : index
      %c0_12 = arith.constant 0 : index
      %c0_13 = arith.constant 0 : index
      %14 = vector.load %arg4[%c0_11, %c0_12, %c0_13] : memref<1x8x128xf32, #tpu.memory_space<vmem>>, vector<1x8x128xf32>
      tpu.vector_store %arg4[%c0_11, %c0_12, %c0_13], %13 {strides = array<i32>} : memref<1x8x128xf32, #tpu.memory_space<vmem>>, vector<1x8x128xf32>,
    } else {
    }
    %c0 = arith.constant 0 : index
    %c0_1 = arith.constant 0 : index
    %3 = vector.load %arg2[%c0, %c0_1] : memref<32x128xf32, #tpu.memory_space<vmem>>, vector<32x128xf32>
    %c0_2 = arith.constant 0 : index
    %c0_3 = arith.constant 0 : index
    %4 = vector.load %arg3[%c0_2, %c0_3] : memref<32x128xf32, #tpu.memory_space<vmem>>, vector<32x128xf32>
    %5 = arith.subf %3, %4 : vector<32x128xf32>
    %6 = arith.mulf %5, %5 : vector<32x128xf32>
    %c0_4 = arith.constant 0 : index
    %c0_5 = arith.constant 0 : index
    %c0_6 = arith.constant 0 : index
    %7 = vector.load %arg4[%c0_4, %c0_5, %c0_6] : memref<1x8x128xf32, #tpu.memory_space<vmem>>, vector<1x8x128xf32>
    %8 = vector.shape_cast %6 : vector<32x128xf32> to vector<4x8x128xf32>
    %cst = arith.constant dense<0.000000e+00> : vector<8x128xf32>
    %9 = vector.multi_reduction <add>, %8, %cst [0] : vector<4x8x128xf32> to vector<8x128xf32>
    %10 = vector.shape_cast %9 : vector<8x128xf32> to vector<1x8x128xf32>
    %11 = arith.addf %7, %10 : vector<1x8x128xf32>
    %c0_7 = arith.constant 0 : index
    %c0_8 = arith.constant 0 : index
    %c0_9 = arith.constant 0 : index
    %12 = vector.load %arg4[%c0_7, %c0_8, %c0_9] : memref<1x8x128xf32, #tpu.memory_space<vmem>>, vector<1x8x128xf32>
    tpu.vector_store %arg4[%c0_7, %c0_8, %c0_9], %11 {strides = array<i32>} : memref<1x8x128xf32, #tpu.memory_space<vmem>>, vector<1x8x128xf32>,
    return
  }
  func.func @transform_0(%arg0: i32, %arg1: i32) -> (i32, i32) {
    %c1_i32 = arith.constant 1 : i32
    %0 = arith.muli %arg0, %c1_i32 : i32
    %1 = arith.addi %0, %arg1 : i32
    %c0_i32 = arith.constant 0 : i32
    %c0_i32_0 = arith.constant 0 : i32
    return %1, %c0_i32 : i32, i32
  }
  func.func @transform_1(%arg0: i32, %arg1: i32) -> (i32, i32) {
    %c1_i32 = arith.constant 1 : i32
    %0 = arith.muli %arg0, %c1_i32 : i32
    %1 = arith.addi %0, %arg1 : i32
    %c0_i32 = arith.constant 0 : i32
    %c0_i32_0 = arith.constant 0 : i32
    return %1, %c0_i32 : i32, i32
  }
  func.func @transform_2(%arg0: i32, %arg1: i32) -> (i32, i32, i32) {
    %c0_i32 = arith.constant 0 : i32
    %c0_i32_0 = arith.constant 0 : i32
    %c0_i32_1 = arith.constant 0 : i32
    return %arg0, %c0_i32, %c0_i32_0 : i32, i32, i32
  }
}

</mosaic_0001>

<bundles_post_ra>
// kernel: tpu_custom_call.1
= control target key start
LH: loop header
LB: loop body
LE: loop exit
PB: predicated region body
PF: predicated region fallthrough
CT: control target
= control target key end

     0   :  { %7 = vsyncpa [#allocation3], 0  ;;  %s229_s0 = inlined_call_operand.hbm [shape: f32[32,128], index: 0, kind: input, shape index: {}]   ;;  %s230_s1 = inlined_call_operand.hbm [shape: f32[32,128], index: 1, kind: input, shape index: {}]   ;;  %s231_s2 = inlined_call_operand.hbm [shape: f32[1,8,128], index: 2, kind: output, shape index: {}]  }
   0x1   :  { %8 = vsyncpa [#allocation6], 0 }
   0x2   :  { %9 = vsyncpa [#allocation4], 0  ;;  %s173_s9 = smov [#allocation2]   ;;  %s101_s13 = scalar_lea.hbm %s229_s0, 512 }
   0x3   :  { %s19_s10 = sshll.u32 %s173_s9, 4  ;;  %p102_p0 = scmp.ne.s32.totalorder %s229_s0, %s101_s13  ;;  %s20_s10 = int_to_ptr.vmem [resolvable:$true] %s19_s10 }
   0x4   :  { %p105_p1 = scmp.lt.u32.totalorder %s101_s13, %s229_s0 }
   0x6   :  { %p107_p2 = pnand %p105_p1, %p102_p0 }
   0x8   :  { %110 = shalt.err (!%p107_p2)
}
   0x9   :  { %s111_s18 = scalar_lea.vmem %s20_s10, 512  ;;  %p116_p4 = scmp.lt.s32.totalorder %s20_s10, %s20_s10 }
   0xa   :  { %p112_p3 = scmp.ne.s32.totalorder %s20_s10, %s111_s18  ;;  %p117_p5 = scmp.lt.s32.totalorder %s111_s18, %s111_s18 }
   0xc   :  { %p118_p6 = por %p117_p5, %p116_p4 }
   0xe   :  { %p119_p7 = pnand %p118_p6, %p112_p3 }
  0x10   :  { %122 = shalt.err (!%p119_p7)
}
  0x11   :  { %s174_s19 = smov 128   ;;  %s175_s20 = smov 8  }
  0x12   :  { %25 = dma.hbm_to_vmem [thread:$0]  %s229_s0, 512, %s20_s10, [#allocation3], %s174_s19, %s174_s19, %s175_s20  }
  0x13   :  { %s176_s23 = smov [#allocation5]   ;;  %s123_s27 = scalar_lea.hbm %s230_s1, 512 }
  0x14   :  { %s35_s24 = sshll.u32 %s176_s23, 4  ;;  %p124_p8 = scmp.ne.s32.totalorder %s230_s1, %s123_s27  ;;  %s36_s24 = int_to_ptr.vmem [resolvable:$true] %s35_s24 }
  0x15   :  { %p127_p9 = scmp.lt.u32.totalorder %s123_s27, %s230_s1 }
  0x17   :  { %p129_p10 = pnand %p127_p9, %p124_p8 }
  0x19   :  { %132 = shalt.err (!%p129_p10)
}
  0x1a   :  { %s133_s4 = scalar_lea.vmem %s36_s24, 512  ;;  %p138_p12 = scmp.lt.s32.totalorder %s36_s24, %s36_s24 }
  0x1b   :  { %p134_p11 = scmp.ne.s32.totalorder %s36_s24, %s133_s4  ;;  %p139_p13 = scmp.lt.s32.totalorder %s133_s4, %s133_s4 }
  0x1d   :  { %p140_p0 = por %p139_p13, %p138_p12 }
  0x1f   :  { %p141_p1 = pnand %p140_p0, %p134_p11 }
  0x21   :  { %144 = shalt.err (!%p141_p1)
}
  0x22   :  { %41 = dma.hbm_to_vmem [thread:$0]  %s230_s1, 512, %s36_s24, [#allocation6], %s174_s19, %s174_s19, %s175_s20  }
  0x23   :  { %167 = dma.done.wait [#allocation3], 512  }
  0x24   :  { %168 = vsyncadd [#allocation3], 4294966784 }
  0x25   :  { %169 = dma.done.wait [#allocation6], 512  }
  0x26   :  { %170 = vsyncadd [#allocation6], 4294966784  ;;  %v57_v0 = vld [vmem:[#allocation2] sm:$0xff]  ;;  %v58_v1 = vld [vmem:[#allocation2 + $0x8] sm:$0xff]  ;;  %s177_s1 = smov [#allocation7]  }
  0x27   :  { %v59_v2 = vld [vmem:[#allocation2 + $0x10] sm:$0xff]  ;;  %v60_v3 = vld [vmem:[#allocation2 + $0x18] sm:$0xff]  ;;  %v61_v4 = vld [vmem:[#allocation5] sm:$0xff]  ;;  %s85_s6 = sshll.u32 %s177_s1, 4  ;;  %s86_s6 = int_to_ptr.vmem [resolvable:$true] %s85_s6 }
  0x28   :  { %v62_v5 = vld [vmem:[#allocation5 + $0x8] sm:$0xff]  ;;  %v63_v6 = vld [vmem:[#allocation5 + $0x10] sm:$0xff]  ;;  %v64_v7 = vld [vmem:[#allocation5 + $0x18] sm:$0xff]  ;;  %v65_v8 = vsub.f32 %v57_v0, %v61_v4  ;;  %s145_s7 = scalar_lea.vmem %s86_s6, 128  ;;  %p150_p3 = scmp.lt.s32.totalorder %s86_s6, %s86_s6 }
  0x29   :  { %v66_v9 = vsub.f32 %v58_v1, %v62_v5  ;;  %v67_v10 = vsub.f32 %v59_v2, %v63_v6  ;;  %v68_v11 = vsub.f32 %v60_v3, %v64_v7  ;;  %p146_p2 = scmp.ne.s32.totalorder %s86_s6, %s145_s7  ;;  %p151_p4 = scmp.lt.s32.totalorder %s145_s7, %s145_s7 }
  0x2a   :  { %v69_v12 = vmul.f32 %v65_v8, %v65_v8 }
  0x2b   :  { %v70_v13 = vmul.f32 %v66_v9, %v66_v9  ;;  %v71_v14 = vmul.f32 %v67_v10, %v67_v10  ;;  %v72_v15 = vmul.f32 %v68_v11, %v68_v11  ;;  %p152_p5 = por %p151_p4, %p150_p3 }
  0x2d   :  { %v74_v16 = vadd.f32 %v70_v13, %v69_v12  ;;  %p153_p6 = pnand %p152_p5, %p146_p2 }
  0x2f   :  { %v75_v17 = vadd.f32 %v74_v16, %v71_v14 }
  0x31   :  { %v76_v18 = vadd.f32 %v75_v17, %v72_v15 }
  0x33   :  { %78 = vst [vmem:[#allocation7] sm:$0xff] %v76_v18 }
  0x34   :  { %156 = shalt.err (!%p153_p6)
}
  0x35   :  { %s157_s10 = scalar_lea.hbm %s231_s2, 128 }
  0x36   :  { %p158_p7 = scmp.ne.s32.totalorder %s231_s2, %s157_s10  ;;  %p161_p8 = scmp.lt.u32.totalorder %s157_s10, %s231_s2 }
  0x38   :  { %p163_p9 = pnand %p161_p8, %p158_p7 }
  0x3a   :  { %166 = shalt.err (!%p163_p9)
}
  0x3b   :  { %88 = dma.vmem_to_hbm [thread:$0]  %s86_s6, 128, %s231_s2, [#allocation4]  }
  0x3c   :  { %171 = dma.done.wait [#allocation4], 128  }
  0x3d   :  { %172 = vsyncadd [#allocation4], 4294967168 }
  0x3e   :  { %92 = vsyncpa [#allocation3], 1 }
  0x3f   :  { %93 = vsyncpa [#allocation6], 1 }
  0x40   :  { %94 = vsyncpa [#allocation4], 1 }

</bundles_post_ra>
